<compile_context>
chip_gen: v6e
topology: v6e:2x2x1
jax: 0.10.0
libtpu: 0.0.40
codegen_flags: <defaults>
</compile_context>

<pallas_src>
import jax
import jax.numpy as jnp
from jax import lax
from jax.experimental import pallas as pl
from jax.experimental.pallas import tpu as pltpu


GAMMA = 1e-4          # regularization weight
ALPHA_T = 1.0         # cold-start weights (step_counter < variance_window)
BETA_T = 0.5

_LANE = 128
NUM_CORES = 2         # max TensorCores per chip (v7x); harmless extra grid split on 1-TC chips


def _vmem_capacity_bytes():
    try:
        return int(pltpu.get_tpu_info().vmem_capacity_bytes)
    except Exception:
        return 64 << 20   # conservative (v7x per-TC VMEM)


def _sublane(dtype):
    """Native packed sublane tile: f32 -> 8, bf16 -> 16, int8/fp8 -> 32."""
    return max(8, 32 // jnp.dtype(dtype).itemsize)


def _fold_factor(d, dv, s):
    """Lane-folding factor g: (B, S, D) -> (B, S//g, g*D) so the lane dim is 128-dense."""
    if d != dv:
        return 1
    if d >= _LANE or _LANE % d != 0:
        return 1
    g = _LANE // d
    if s % g != 0:
        return 1
    return g


def _pick_tile(b, s_f, d_f, dv_f, itemsize, budget_bytes, sublane, num_cores):
    """Largest folded-S tile whose 4 double-buffered input blocks fit the budget,
    rounded to the dtype's native sublane tile, capped at one core's share."""
    bytes_per_row = 2 * b * (2 * d_f + 2 * dv_f) * itemsize   # x2: double buffering
    tile = budget_bytes // max(bytes_per_row, 1)
    per_core = -(-s_f // num_cores)
    tile = int(min(tile, per_core))
    tile = max((tile // sublane) * sublane, sublane)
    return tile


def _build_reduce_kernel():
    """Per-(core, tile) fused single-pass reductions, accumulated into per-core outputs."""

    def kernel(pred_ref, tgt_ref, vis_ref, struct_ref,
               d2_ref, p2_ref, psum_ref, vsum_ref, ssum_ref):
        t = pl.program_id(1)

        @pl.when(t == 0)
        def _init():
            d2_ref[...] = jnp.zeros_like(d2_ref)
            p2_ref[...] = jnp.zeros_like(p2_ref)
            psum_ref[...] = jnp.zeros_like(psum_ref)
            vsum_ref[...] = jnp.zeros_like(vsum_ref)
            ssum_ref[...] = jnp.zeros_like(ssum_ref)

        pred = pred_ref[...].astype(jnp.float32)      # (B, TS, g*D)
        tgt = tgt_ref[...].astype(jnp.float32)        # (B, TS, g*D)
        vis = vis_ref[...].astype(jnp.float32)        # (B, TS, g*Dv)
        struct = struct_ref[...].astype(jnp.float32)  # (B, TS, g*Dv)

        diff = pred - tgt
        d2_ref[...] += jnp.sum(diff * diff, axis=1)[None]     # (1, B, g*D)
        p2_ref[...] += jnp.sum(pred * pred, axis=1)[None]     # (1, B, g*D)
        psum_ref[...] += jnp.sum(pred, axis=1)[None]          # (1, B, g*D)
        vsum_ref[...] += jnp.sum(vis, axis=1)[None]           # (1, B, g*Dv)
        ssum_ref[...] += jnp.sum(struct, axis=1)[None]        # (1, B, g*Dv)

    return kernel


def _build_epilogue_kernel(B, S, D, Dv, g):
    """Combine per-core partials; compute MSE, reg, entropy, contrastive CE, totals."""
    n_elems = float(B * S * D)
    inv_s = 1.0 / float(S)

    def kernel(d2_ref, p2_ref, psum_ref, vsum_ref, ssum_ref, out_ref):
        # ---- base loss (MSE, mean reduction) + L2 regularization -----------------
        mse = jnp.sum(d2_ref[...]) * (1.0 / n_elems)
        reg = GAMMA * jnp.sqrt(jnp.sum(p2_ref[...]))

        # ---- combine cores, unfold lane-folded pooled sums: (B, g*d) -> (B, d) ---
        pred_sum = jnp.sum(psum_ref[...], axis=0)     # (B, g*D)
        vis_sum = jnp.sum(vsum_ref[...], axis=0)      # (B, g*Dv)
        struct_sum = jnp.sum(ssum_ref[...], axis=0)   # (B, g*Dv)

        def unfold(x_f, d):
            out = x_f[:, 0:d]
            for j in range(1, g):
                out = out + x_f[:, j * d:(j + 1) * d]
            return out

        pred_mean = unfold(pred_sum, D) * inv_s          # (B, D)
        vis_pooled = unfold(vis_sum, Dv) * inv_s         # (B, Dv)
        struct_pooled = unfold(struct_sum, Dv) * inv_s   # (B, Dv)

        # ---- softmax attention + entropy (exact divide; matches torch log(a+1e-8))
        pm = pred_mean - jnp.max(pred_mean, axis=-1, keepdims=True)
        pe = jnp.exp(pm)
        attn = pe / jnp.sum(pe, axis=-1, keepdims=True)
        ent = -jnp.sum(attn * jnp.log(attn + 1e-8), axis=-1)
        ent_mean = jnp.mean(ent)

        # ---- L2 normalize + contrastive CE with labels = arange(B) ---------------
        def l2norm(x):
            n2 = jnp.sum(x * x, axis=-1, keepdims=True)
            # F.normalize(eps=1e-12): clamp ||x|| at 1e-12  =>  ||x||^2 at 1e-24
            return x * lax.rsqrt(jnp.maximum(n2, 1e-24))

        vn = l2norm(vis_pooled)        # (B, Dv)
        sn = l2norm(struct_pooled)     # (B, Dv)
        # contract on last dims -> (B, B); no explicit transpose materialized
        sim = lax.dot_general(vn, sn, (((1,), (1,)), ((), ())),
                              preferred_element_type=jnp.float32)

        sim_max = jnp.max(sim, axis=-1, keepdims=True)
        lse = jnp.log(jnp.sum(jnp.exp(sim - sim_max), axis=-1, keepdims=True)) + sim_max
        row = lax.broadcasted_iota(jnp.int32, sim.shape, 0)
        col = lax.broadcasted_iota(jnp.int32, sim.shape, 1)
        diag = jnp.sum(jnp.where(row == col, sim, 0.0), axis=-1, keepdims=True)
        contrastive = jnp.mean(lse - diag)

        align = contrastive * ent_mean
        total = ALPHA_T * mse + BETA_T * align + reg

        out_ref[0] = total
        out_ref[1] = mse
        out_ref[2] = align
        out_ref[3] = jnp.float32(ALPHA_T)
        out_ref[4] = jnp.float32(BETA_T)
        out_ref[5] = reg

    return kernel


def variance_aware_loss(predictions, targets, visual_features, structure_context,
                        *, vmem_budget_bytes=None):
    """Two-stage Pallas pipeline: megacore-parallel streaming reduction + tiny epilogue."""
    B, S, D = predictions.shape
    assert targets.shape == (B, S, D)
    Bv, Sv, Dv = visual_features.shape
    Bs, Ss, Ds = structure_context.shape
    assert Bv == B and Bs == B and Ds == Dv
    assert Sv == S and Ss == S   # see TODO(synk) in header

    capacity = _vmem_capacity_bytes()
    if vmem_budget_bytes is None:
        vmem_budget_bytes = (40 << 20) if capacity >= (96 << 20) else (12 << 20)

    # Lane-dense folding of the sequence axis when D < 128. For default row-major
    # layouts this reshape preserves element order => free view, no HBM relayout copy.
    g = _fold_factor(D, Dv, S)
    S_f = S // g
    D_f = g * D
    Dv_f = g * Dv
    pred_f = jnp.reshape(predictions, (B, S_f, D_f))
    tgt_f = jnp.reshape(targets, (B, S_f, D_f))
    vis_f = jnp.reshape(visual_features, (B, S_f, Dv_f))
    struct_f = jnp.reshape(structure_context, (B, S_f, Dv_f))

    itemsize = jnp.dtype(predictions.dtype).itemsize
    sublane = _sublane(predictions.dtype)
    tile = _pick_tile(B, S_f, D_f, Dv_f, itemsize, vmem_budget_bytes, sublane, NUM_CORES)

    tiles_per_core = -(-S_f // (NUM_CORES * tile))
    S_pad_f = NUM_CORES * tiles_per_core * tile
    pad = S_pad_f - S_f
    if pad:
        # Zero rows are sum-neutral; n_elems / inv_s in the epilogue use the original S.
        # TODO(synk): for very large awkward S, mask the final tile in-kernel instead of
        # materializing a padded HBM copy.
        _p = lambda x: jnp.pad(x, ((0, 0), (0, pad), (0, 0)))
        pred_f, tgt_f, vis_f, struct_f = _p(pred_f), _p(tgt_f), _p(vis_f), _p(struct_f)

    T = tiles_per_core
    in_idx = lambda c, t: (0, c * T + t, 0)
    out_idx = lambda c, t: (c, 0, 0)

    block_in_bytes = B * tile * (2 * D_f + 2 * Dv_f) * itemsize
    block_f32_bytes = B * tile * (2 * D_f + 2 * Dv_f) * 4
    vmem_limit = 2 * block_in_bytes + 2 * block_f32_bytes + (8 << 20)
    vmem_limit = max(vmem_limit, 16 << 20)
    vmem_limit = int(min(vmem_limit, (capacity * 3) // 4))   # keep >=25% physical headroom

    partials = pl.pallas_call(
        _build_reduce_kernel(),
        out_shape=(
            jax.ShapeDtypeStruct((NUM_CORES, B, D_f), jnp.float32),   # sum(diff^2)
            jax.ShapeDtypeStruct((NUM_CORES, B, D_f), jnp.float32),   # sum(pred^2)
            jax.ShapeDtypeStruct((NUM_CORES, B, D_f), jnp.float32),   # sum_S(pred)
            jax.ShapeDtypeStruct((NUM_CORES, B, Dv_f), jnp.float32),  # sum_S(visual)
            jax.ShapeDtypeStruct((NUM_CORES, B, Dv_f), jnp.float32),  # sum_S(structure)
        ),
        grid=(NUM_CORES, T),
        in_specs=[
            pl.BlockSpec((B, tile, D_f), in_idx),
            pl.BlockSpec((B, tile, D_f), in_idx),
            pl.BlockSpec((B, tile, Dv_f), in_idx),
            pl.BlockSpec((B, tile, Dv_f), in_idx),
        ],
        out_specs=(
            pl.BlockSpec((1, B, D_f), out_idx),
            pl.BlockSpec((1, B, D_f), out_idx),
            pl.BlockSpec((1, B, D_f), out_idx),
            pl.BlockSpec((1, B, Dv_f), out_idx),
            pl.BlockSpec((1, B, Dv_f), out_idx),
        ),
        compiler_params=pltpu.CompilerParams(
            dimension_semantics=("parallel", "arbitrary"),
            vmem_limit_bytes=vmem_limit,
        ),
    )(pred_f, tgt_f, vis_f, struct_f)

    out = pl.pallas_call(
        _build_epilogue_kernel(B, S, D, Dv, g),
        out_shape=jax.ShapeDtypeStruct((6,), jnp.float32),
        in_specs=[pl.BlockSpec(memory_space=pltpu.MemorySpace.VMEM)] * 5,
        out_specs=pl.BlockSpec(memory_space=pltpu.MemorySpace.SMEM),
    )(*partials)

    return {
        "total_loss": out[0],
        "base_loss": out[1],
        "alignment_loss": out[2],
        "alpha_weight": out[3],
        "beta_weight": out[4],
        "regularization_loss": out[5],
    }


def _reference(predictions, targets, visual_features, structure_context):
    """Pure-JAX reference mirroring the PyTorch forward."""
    pred = predictions.astype(jnp.float32)
    tgt = targets.astype(jnp.float32)
    vis = visual_features.astype(jnp.float32)
    struct = structure_context.astype(jnp.float32)

    mse = jnp.mean((pred - tgt) ** 2)
    reg = GAMMA * jnp.sqrt(jnp.sum(pred ** 2))

    vis_pooled = vis.mean(axis=1)
    struct_pooled = struct.mean(axis=1)
    attn = jax.nn.softmax(pred.mean(axis=1), axis=-1)
    ent = -jnp.sum(attn * jnp.log(attn + 1e-8), axis=-1)

    def _n(x):
        return x / jnp.maximum(jnp.linalg.norm(x, axis=-1, keepdims=True), 1e-12)

    sim = _n(vis_pooled) @ _n(struct_pooled).T
    ce = jnp.mean(jax.nn.logsumexp(sim, axis=-1) - jnp.diagonal(sim))
    align = ce * ent.mean()
    total = ALPHA_T * mse + BETA_T * align + reg
    return total, mse, align, reg


if __name__ == "__main__":
    B, D = 4, 32
    root = jax.random.PRNGKey(0)

    # Configs exercise: (1) default budget single-tile-per-core, (2) tiny budget forcing the
    # multi-tile init/accumulate path, (3) non-divisible folded S -> zero-padding path,
    # (4) bf16 inputs -> 16-row sublane tile + padding.
    configs = [
        (64, jnp.float32, None),
        (256, jnp.float32, 64 * 1024),
        (100, jnp.float32, 64 * 1024),
        (64, jnp.bfloat16, None),
    ]

    for i, (S, dtype, budget) in enumerate(configs):
        k0, k1, k2, k3 = jax.random.split(jax.random.fold_in(root, i), 4)
        predictions = jax.random.normal(k0, (B, S, D), dtype=jnp.float32).astype(dtype)
        targets = jax.random.normal(k1, (B, S, D), dtype=jnp.float32).astype(dtype)
        visual_features = jax.random.normal(k2, (B, S, D), dtype=jnp.float32).astype(dtype)
        structure_context = jax.random.normal(k3, (B, S, D), dtype=jnp.float32).astype(dtype)

        ref_total, ref_mse, ref_align, ref_reg = _reference(
            predictions, targets, visual_features, structure_context)

        out = variance_aware_loss(predictions, targets, visual_features,
                                  structure_context, vmem_budget_bytes=budget)
        out = jax.block_until_ready(out)

        assert jnp.allclose(out["total_loss"], ref_total, rtol=2e-3, atol=2e-4), \
            (i, out["total_loss"], ref_total)
        assert jnp.allclose(out["base_loss"], ref_mse, rtol=2e-3, atol=2e-4)
        assert jnp.allclose(out["alignment_loss"], ref_align, rtol=2e-3, atol=2e-4)
        assert jnp.allclose(out["regularization_loss"], ref_reg, rtol=2e-3, atol=2e-4)
        assert jnp.allclose(out["alpha_weight"], 1.0)
        assert jnp.allclose(out["beta_weight"], 0.5)

    print("KERNEL_OK")
</pallas_src>

<mosaic_0001>
module attributes {stable_mosaic.version = 11 : i64} {
  func.func @kernel(%arg0: i32, %arg1: i32, %arg2: memref<4x8x128xf32, #tpu.memory_space<vmem>>, %arg3: memref<4x8x128xf32, #tpu.memory_space<vmem>>, %arg4: memref<4x8x128xf32, #tpu.memory_space<vmem>>, %arg5: memref<4x8x128xf32, #tpu.memory_space<vmem>>, %arg6: memref<1x4x128xf32, #tpu.memory_space<vmem>>, %arg7: memref<1x4x128xf32, #tpu.memory_space<vmem>>, %arg8: memref<1x4x128xf32, #tpu.memory_space<vmem>>, %arg9: memref<1x4x128xf32, #tpu.memory_space<vmem>>, %arg10: memref<1x4x128xf32, #tpu.memory_space<vmem>>) attributes {dimension_semantics = [#tpu.dimension_semantics<parallel>, #tpu.dimension_semantics<arbitrary>], iteration_bounds = array<i64: 2, 1>, scalar_prefetch = 0 : i64, scratch_operands = 0 : i64, tpu.core_type = #tpu.core_type<tc>, window_params = [{transform_indices = @transform_0, window_bounds = array<i64: 4, 8, 128>}, {transform_indices = @transform_1, window_bounds = array<i64: 4, 8, 128>}, {transform_indices = @transform_2, window_bounds = array<i64: 4, 8, 128>}, {transform_indices = @transform_3, window_bounds = array<i64: 4, 8, 128>}, {transform_indices = @transform_4, window_bounds = array<i64: 1, 4, 128>}, {transform_indices = @transform_5, window_bounds = array<i64: 1, 4, 128>}, {transform_indices = @transform_6, window_bounds = array<i64: 1, 4, 128>}, {transform_indices = @transform_7, window_bounds = array<i64: 1, 4, 128>}, {transform_indices = @transform_8, window_bounds = array<i64: 1, 4, 128>}]} {
    %c0_i32 = arith.constant 0 : i32
    %0 = arith.cmpi eq, %arg1, %c0_i32 : i32
    %1 = arith.extui %0 : i1 to i32
    %c0_i32_0 = arith.constant 0 : i32
    %2 = arith.cmpi ne, %1, %c0_i32_0 : i32
    scf.if %2 {
      %cst_46 = arith.constant 0.000000e+00 : f32
      %35 = vector.broadcast %cst_46 : f32 to vector<1x4x128xf32>
      %c0_47 = arith.constant 0 : index
      %c0_48 = arith.constant 0 : index
      %c0_49 = arith.constant 0 : index
      %36 = vector.load %arg6[%c0_47, %c0_48, %c0_49] : memref<1x4x128xf32, #tpu.memory_space<vmem>>, vector<1x4x128xf32>
      tpu.vector_store %arg6[%c0_47, %c0_48, %c0_49], %35 {strides = array<i32>} : memref<1x4x128xf32, #tpu.memory_space<vmem>>, vector<1x4x128xf32>,
      %cst_50 = arith.constant 0.000000e+00 : f32
      %37 = vector.broadcast %cst_50 : f32 to vector<1x4x128xf32>
      %c0_51 = arith.constant 0 : index
      %c0_52 = arith.constant 0 : index
      %c0_53 = arith.constant 0 : index
      %38 = vector.load %arg7[%c0_51, %c0_52, %c0_53] : memref<1x4x128xf32, #tpu.memory_space<vmem>>, vector<1x4x128xf32>
      tpu.vector_store %arg7[%c0_51, %c0_52, %c0_53], %37 {strides = array<i32>} : memref<1x4x128xf32, #tpu.memory_space<vmem>>, vector<1x4x128xf32>,
      %cst_54 = arith.constant 0.000000e+00 : f32
      %39 = vector.broadcast %cst_54 : f32 to vector<1x4x128xf32>
      %c0_55 = arith.constant 0 : index
      %c0_56 = arith.constant 0 : index
      %c0_57 = arith.constant 0 : index
      %40 = vector.load %arg8[%c0_55, %c0_56, %c0_57] : memref<1x4x128xf32, #tpu.memory_space<vmem>>, vector<1x4x128xf32>
      tpu.vector_store %arg8[%c0_55, %c0_56, %c0_57], %39 {strides = array<i32>} : memref<1x4x128xf32, #tpu.memory_space<vmem>>, vector<1x4x128xf32>,
      %cst_58 = arith.constant 0.000000e+00 : f32
      %41 = vector.broadcast %cst_58 : f32 to vector<1x4x128xf32>
      %c0_59 = arith.constant 0 : index
      %c0_60 = arith.constant 0 : index
      %c0_61 = arith.constant 0 : index
      %42 = vector.load %arg9[%c0_59, %c0_60, %c0_61] : memref<1x4x128xf32, #tpu.memory_space<vmem>>, vector<1x4x128xf32>
      tpu.vector_store %arg9[%c0_59, %c0_60, %c0_61], %41 {strides = array<i32>} : memref<1x4x128xf32, #tpu.memory_space<vmem>>, vector<1x4x128xf32>,
      %cst_62 = arith.constant 0.000000e+00 : f32
      %43 = vector.broadcast %cst_62 : f32 to vector<1x4x128xf32>
      %c0_63 = arith.constant 0 : index
      %c0_64 = arith.constant 0 : index
      %c0_65 = arith.constant 0 : index
      %44 = vector.load %arg10[%c0_63, %c0_64, %c0_65] : memref<1x4x128xf32, #tpu.memory_space<vmem>>, vector<1x4x128xf32>
      tpu.vector_store %arg10[%c0_63, %c0_64, %c0_65], %43 {strides = array<i32>} : memref<1x4x128xf32, #tpu.memory_space<vmem>>, vector<1x4x128xf32>,
    } else {
    }
    %c0 = arith.constant 0 : index
    %c0_1 = arith.constant 0 : index
    %c0_2 = arith.constant 0 : index
    %3 = vector.load %arg2[%c0, %c0_1, %c0_2] : memref<4x8x128xf32, #tpu.memory_space<vmem>>, vector<4x8x128xf32>
    %c0_3 = arith.constant 0 : index
    %c0_4 = arith.constant 0 : index
    %c0_5 = arith.constant 0 : index
    %4 = vector.load %arg3[%c0_3, %c0_4, %c0_5] : memref<4x8x128xf32, #tpu.memory_space<vmem>>, vector<4x8x128xf32>
    %c0_6 = arith.constant 0 : index
    %c0_7 = arith.constant 0 : index
    %c0_8 = arith.constant 0 : index
    %5 = vector.load %arg4[%c0_6, %c0_7, %c0_8] : memref<4x8x128xf32, #tpu.memory_space<vmem>>, vector<4x8x128xf32>
    %c0_9 = arith.constant 0 : index
    %c0_10 = arith.constant 0 : index
    %c0_11 = arith.constant 0 : index
    %6 = vector.load %arg5[%c0_9, %c0_10, %c0_11] : memref<4x8x128xf32, #tpu.memory_space<vmem>>, vector<4x8x128xf32>
    %7 = arith.subf %3, %4 : vector<4x8x128xf32>
    %c0_12 = arith.constant 0 : index
    %c0_13 = arith.constant 0 : index
    %c0_14 = arith.constant 0 : index
    %8 = vector.load %arg6[%c0_12, %c0_13, %c0_14] : memref<1x4x128xf32, #tpu.memory_space<vmem>>, vector<1x4x128xf32>
    %9 = arith.mulf %7, %7 : vector<4x8x128xf32>
    %cst = arith.constant dense<0.000000e+00> : vector<4x128xf32>
    %10 = vector.multi_reduction <add>, %9, %cst [1] : vector<4x8x128xf32> to vector<4x128xf32>
    %11 = vector.shape_cast %10 : vector<4x128xf32> to vector<1x4x128xf32>
    %12 = arith.addf %8, %11 : vector<1x4x128xf32>
    %c0_15 = arith.constant 0 : index
    %c0_16 = arith.constant 0 : index
    %c0_17 = arith.constant 0 : index
    %13 = vector.load %arg6[%c0_15, %c0_16, %c0_17] : memref<1x4x128xf32, #tpu.memory_space<vmem>>, vector<1x4x128xf32>
    tpu.vector_store %arg6[%c0_15, %c0_16, %c0_17], %12 {strides = array<i32>} : memref<1x4x128xf32, #tpu.memory_space<vmem>>, vector<1x4x128xf32>,
    %c0_18 = arith.constant 0 : index
    %c0_19 = arith.constant 0 : index
    %c0_20 = arith.constant 0 : index
    %14 = vector.load %arg7[%c0_18, %c0_19, %c0_20] : memref<1x4x128xf32, #tpu.memory_space<vmem>>, vector<1x4x128xf32>
    %15 = arith.mulf %3, %3 : vector<4x8x128xf32>
    %cst_21 = arith.constant dense<0.000000e+00> : vector<4x128xf32>
    %16 = vector.multi_reduction <add>, %15, %cst_21 [1] : vector<4x8x128xf32> to vector<4x128xf32>
    %17 = vector.shape_cast %16 : vector<4x128xf32> to vector<1x4x128xf32>
    %18 = arith.addf %14, %17 : vector<1x4x128xf32>
    %c0_22 = arith.constant 0 : index
    %c0_23 = arith.constant 0 : index
    %c0_24 = arith.constant 0 : index
    %19 = vector.load %arg7[%c0_22, %c0_23, %c0_24] : memref<1x4x128xf32, #tpu.memory_space<vmem>>, vector<1x4x128xf32>
    tpu.vector_store %arg7[%c0_22, %c0_23, %c0_24], %18 {strides = array<i32>} : memref<1x4x128xf32, #tpu.memory_space<vmem>>, vector<1x4x128xf32>,
    %c0_25 = arith.constant 0 : index
    %c0_26 = arith.constant 0 : index
    %c0_27 = arith.constant 0 : index
    %20 = vector.load %arg8[%c0_25, %c0_26, %c0_27] : memref<1x4x128xf32, #tpu.memory_space<vmem>>, vector<1x4x128xf32>
    %cst_28 = arith.constant dense<0.000000e+00> : vector<4x128xf32>
    %21 = vector.multi_reduction <add>, %3, %cst_28 [1] : vector<4x8x128xf32> to vector<4x128xf32>
    %22 = vector.shape_cast %21 : vector<4x128xf32> to vector<1x4x128xf32>
    %23 = arith.addf %20, %22 : vector<1x4x128xf32>
    %c0_29 = arith.constant 0 : index
    %c0_30 = arith.constant 0 : index
    %c0_31 = arith.constant 0 : index
    %24 = vector.load %arg8[%c0_29, %c0_30, %c0_31] : memref<1x4x128xf32, #tpu.memory_space<vmem>>, vector<1x4x128xf32>
    tpu.vector_store %arg8[%c0_29, %c0_30, %c0_31], %23 {strides = array<i32>} : memref<1x4x128xf32, #tpu.memory_space<vmem>>, vector<1x4x128xf32>,
    %c0_32 = arith.constant 0 : index
    %c0_33 = arith.constant 0 : index
    %c0_34 = arith.constant 0 : index
    %25 = vector.load %arg9[%c0_32, %c0_33, %c0_34] : memref<1x4x128xf32, #tpu.memory_space<vmem>>, vector<1x4x128xf32>
    %cst_35 = arith.constant dense<0.000000e+00> : vector<4x128xf32>
    %26 = vector.multi_reduction <add>, %5, %cst_35 [1] : vector<4x8x128xf32> to vector<4x128xf32>
    %27 = vector.shape_cast %26 : vector<4x128xf32> to vector<1x4x128xf32>
    %28 = arith.addf %25, %27 : vector<1x4x128xf32>
    %c0_36 = arith.constant 0 : index
    %c0_37 = arith.constant 0 : index
    %c0_38 = arith.constant 0 : index
    %29 = vector.load %arg9[%c0_36, %c0_37, %c0_38] : memref<1x4x128xf32, #tpu.memory_space<vmem>>, vector<1x4x128xf32>
    tpu.vector_store %arg9[%c0_36, %c0_37, %c0_38], %28 {strides = array<i32>} : memref<1x4x128xf32, #tpu.memory_space<vmem>>, vector<1x4x128xf32>,
    %c0_39 = arith.constant 0 : index
    %c0_40 = arith.constant 0 : index
    %c0_41 = arith.constant 0 : index
    %30 = vector.load %arg10[%c0_39, %c0_40, %c0_41] : memref<1x4x128xf32, #tpu.memory_space<vmem>>, vector<1x4x128xf32>
    %cst_42 = arith.constant dense<0.000000e+00> : vector<4x128xf32>
    %31 = vector.multi_reduction <add>, %6, %cst_42 [1] : vector<4x8x128xf32> to vector<4x128xf32>
    %32 = vector.shape_cast %31 : vector<4x128xf32> to vector<1x4x128xf32>
    %33 = arith.addf %30, %32 : vector<1x4x128xf32>
    %c0_43 = arith.constant 0 : index
    %c0_44 = arith.constant 0 : index
    %c0_45 = arith.constant 0 : index
    %34 = vector.load %arg10[%c0_43, %c0_44, %c0_45] : memref<1x4x128xf32, #tpu.memory_space<vmem>>, vector<1x4x128xf32>
    tpu.vector_store %arg10[%c0_43, %c0_44, %c0_45], %33 {strides = array<i32>} : memref<1x4x128xf32, #tpu.memory_space<vmem>>, vector<1x4x128xf32>,
    return
  }
  func.func @transform_0(%arg0: i32, %arg1: i32) -> (i32, i32, i32) {
    %c1_i32 = arith.constant 1 : i32
    %0 = arith.muli %arg0, %c1_i32 : i32
    %1 = arith.addi %0, %arg1 : i32
    %c0_i32 = arith.constant 0 : i32
    %c0_i32_0 = arith.constant 0 : i32
    %c0_i32_1 = arith.constant 0 : i32
    return %c0_i32, %1, %c0_i32_0 : i32, i32, i32
  }
  func.func @transform_1(%arg0: i32, %arg1: i32) -> (i32, i32, i32) {
    %c1_i32 = arith.constant 1 : i32
    %0 = arith.muli %arg0, %c1_i32 : i32
    %1 = arith.addi %0, %arg1 : i32
    %c0_i32 = arith.constant 0 : i32
    %c0_i32_0 = arith.constant 0 : i32
    %c0_i32_1 = arith.constant 0 : i32
    return %c0_i32, %1, %c0_i32_0 : i32, i32, i32
  }
  func.func @transform_2(%arg0: i32, %arg1: i32) -> (i32, i32, i32) {
    %c1_i32 = arith.constant 1 : i32
    %0 = arith.muli %arg0, %c1_i32 : i32
    %1 = arith.addi %0, %arg1 : i32
    %c0_i32 = arith.constant 0 : i32
    %c0_i32_0 = arith.constant 0 : i32
    %c0_i32_1 = arith.constant 0 : i32
    return %c0_i32, %1, %c0_i32_0 : i32, i32, i32
  }
  func.func @transform_3(%arg0: i32, %arg1: i32) -> (i32, i32, i32) {
    %c1_i32 = arith.constant 1 : i32
    %0 = arith.muli %arg0, %c1_i32 : i32
    %1 = arith.addi %0, %arg1 : i32
    %c0_i32 = arith.constant 0 : i32
    %c0_i32_0 = arith.constant 0 : i32
    %c0_i32_1 = arith.constant 0 : i32
    return %c0_i32, %1, %c0_i32_0 : i32, i32, i32
  }
  func.func @transform_4(%arg0: i32, %arg1: i32) -> (i32, i32, i32) {
    %c0_i32 = arith.constant 0 : i32
    %c0_i32_0 = arith.constant 0 : i32
    %c0_i32_1 = arith.constant 0 : i32
    return %arg0, %c0_i32, %c0_i32_0 : i32, i32, i32
  }
  func.func @transform_5(%arg0: i32, %arg1: i32) -> (i32, i32, i32) {
    %c0_i32 = arith.constant 0 : i32
    %c0_i32_0 = arith.constant 0 : i32
    %c0_i32_1 = arith.constant 0 : i32
    return %arg0, %c0_i32, %c0_i32_0 : i32, i32, i32
  }
  func.func @transform_6(%arg0: i32, %arg1: i32) -> (i32, i32, i32) {
    %c0_i32 = arith.constant 0 : i32
    %c0_i32_0 = arith.constant 0 : i32
    %c0_i32_1 = arith.constant 0 : i32
    return %arg0, %c0_i32, %c0_i32_0 : i32, i32, i32
  }
  func.func @transform_7(%arg0: i32, %arg1: i32) -> (i32, i32, i32) {
    %c0_i32 = arith.constant 0 : i32
    %c0_i32_0 = arith.constant 0 : i32
    %c0_i32_1 = arith.constant 0 : i32
    return %arg0, %c0_i32, %c0_i32_0 : i32, i32, i32
  }
  func.func @transform_8(%arg0: i32, %arg1: i32) -> (i32, i32, i32) {
    %c0_i32 = arith.constant 0 : i32
    %c0_i32_0 = arith.constant 0 : i32
    %c0_i32_1 = arith.constant 0 : i32
    return %arg0, %c0_i32, %c0_i32_0 : i32, i32, i32
  }
}

</mosaic_0001>

<bundles_post_ra>
// kernel: tpu_custom_call.1
= control target key start
LH: loop header
LB: loop body
LE: loop exit
PB: predicated region body
PF: predicated region fallthrough
CT: control target
= control target key end

     0   :  { %s2023_s0 = inlined_call_operand.hbm [shape: f32[4,16,128], index: 0, kind: input, shape index: {}]   ;;  %s2024_s1 = inlined_call_operand.hbm [shape: f32[4,16,128], index: 1, kind: input, shape index: {}]   ;;  %s2025_s2 = inlined_call_operand.hbm [shape: f32[4,16,128], index: 2, kind: input, shape index: {}]   ;;  %s2026_s3 = inlined_call_operand.hbm [shape: f32[4,16,128], index: 3, kind: input, shape index: {}]   ;;  %s2027_s4 = inlined_call_operand.hbm [shape: f32[2,4,128], index: 4, kind: output, shape index: {0}]   ;;  %s2028_s5 = inlined_call_operand.hbm [shape: f32[2,4,128], index: 5, kind: output, shape index: {1}]   ;;  %s2029_s6 = inlined_call_operand.hbm [shape: f32[2,4,128], index: 6, kind: output, shape index: {2}]   ;;  %s2030_s7 = inlined_call_operand.hbm [shape: f32[2,4,128], index: 7, kind: output, shape index: {3}]   ;;  %s2031_s8 = inlined_call_operand.hbm [shape: f32[2,4,128], index: 8, kind: output, shape index: {4}]  }
   0x1   :  { %2044 = sst [smem:[#allocation30_spill]] %s2023_s0 }
   0x2   :  { %2045 = sst [smem:[#allocation31_spill]] %s2024_s1 }
   0x3   :  { %2046 = sst [smem:[#allocation32_spill]] %s2029_s6 }
   0x4   :  { %2047 = sst [smem:[#allocation33_spill]] %s2031_s8 }
   0x5   :  { %14 = vsyncpa [#allocation3], 0 }
   0x6   :  { %16 = vsyncpa [#allocation3 + $0x1], 0 }
   0x7   :  { %17 = vsyncpa [#allocation6], 0 }
   0x8   :  { %19 = vsyncpa [#allocation6 + $0x1], 0 }
   0x9   :  { %20 = vsyncpa [#allocation9], 0 }
   0xa   :  { %22 = vsyncpa [#allocation9 + $0x1], 0 }
   0xb   :  { %23 = vsyncpa [#allocation4], 0 }
   0xc   :  { %25 = vsyncpa [#allocation4 + $0x1], 0 }
   0xd   :  { %26 = vsyncpa [#allocation12], 0 }
   0xe   :  { %28 = vsyncpa [#allocation12 + $0x1], 0 }
   0xf   :  { %29 = vsyncpa [#allocation15], 0 }
  0x10   :  { %31 = vsyncpa [#allocation15 + $0x1], 0  ;;  %s1578_s27 = smov 0   ;;  %s1580_s28 = smov 0  }
  0x11   :  { %s1582_s29 = smov 0   ;;  %s1584_s30 = smov 0  }
  0x12   :  { %s1586_s9 = smov 0   ;;  %s1588_s10 = smov 0  }
  0x13 LB: > { %2048 = sst [smem:[#allocation23_spill]] %s1498_s27  ;;  %s1609_s11 = sadd.s32 4294967295, %s1518_s10   ;;  %s1518_s10 = sphi %s1588_s10, %s37_s10   ;;  %s1514_s9 = sphi %s1586_s9, %s2074_s9   ;;  %s1510_s30 = sphi %s1584_s30, %s2073_s30   ;;  %s1506_s29 = sphi %s1582_s29, %s2072_s29   ;;  %s1502_s28 = sphi %s1580_s28, %s2076_s28   ;;  %s1498_s27 = sphi %s1578_s27, %s2075_s27  }
  0x14   : > { %2049 = sst [smem:[#allocation24_spill]] %s1506_s29  ;;  %s2032_s12 = sadd.s32 4294967294, %s1518_s10  }
  0x15   : > { %2050 = sst [smem:[#allocation25_spill]] %s1514_s9  ;;  %s49_s13 = sadd.s32 1, %s1514_s9 }
  0x16   : > { %2051 = sst [smem:[#allocation26_spill]] %s1518_s10  ;;  %s58_s14 = sadd.s32 1, %s1506_s29 }
  0x17   : > { %p51_p0 = scmp.ge.s32.totalorder %s49_s13, 2  ;;  %p65_p1 = scmp.ne.s32.totalorder %s1506_s29, %s1502_s28 }
  0x18   : > { %p66_p2 = scmp.eq.s32.totalorder %s1518_s10, 0  ;;  %p71_p3 = scmp.ne.s32.totalorder %s1502_s28, %s1498_s27 }
  0x19   : > { %s2078_s13 = smov (%p51_p0, %s49_s13), 0  ;;  %p72_p5 = scmp.eq.s32.totalorder %s1609_s11, 0 }
  0x1a   : > { %2052 = sst [smem:[#allocation27_spill]] %s2078_s13  ;;  %p1621_p4 = por %p66_p2, %p65_p1 }
  0x1b   : > { %s55_s16 = ssub.s32 %s1514_s9, %s2078_s13  ;;  %p179_p6 = scmp.eq.s32.totalorder %s1609_s11, 1 }
  0x1c   : > { %p56_p7 = scmp.eq.s32.totalorder %s55_s16, 0  ;;  %p1629_p8 = por %p72_p5, %p71_p3 }
  0x1d   : > { %p1633_p9 = por %p179_p6, %p65_p1  ;;  %p185_p10 = scmp.eq.s32.totalorder %s2032_s12, 1 }
  0x1e   : > { %s1640_s19 = scalar_select %p56_p7, %s1506_s29, %s58_s14  }
  0x1f   : > { %p1642_p11 = por %p185_p10, %p71_p3  ;;  %p1152_p13 = scmp.lt.s32.totalorder %s1518_s10, 2 }
  0x20   : > { %2056 = sst [smem:[#allocation28_spill]] %s1640_s19  ;;  %s1649_s21 = sand.u32 1, %s1506_s29  }
  0x21   : > { %s2057_s20 = scalar_select %p1642_p11, 1, 0 }
  0x22   : > { %s1652_s22 = sshll.u32 %s1649_s21, 5  ;;  %s1655_s23 = sshll.u32 %s1514_s9, 7 }
  0x23   : > { %2058 = sst [smem:[#allocation29_spill]] %s2057_s20  ;;  %p1659_p0 = pnand %p1152_p13, %p1621_p4 }
  0x24   : > { %s330_s25 = sand.u32 1, %s1518_s10   ;;  %s2060_s1 = sld [smem:[#allocation31_spill]] }
  0x25   : > { %s334_s12 = scalar_lea.vmem [#allocation5], %s1652_s22  ;;  %p1083_p1 = scmp.ge.s32.totalorder %s1518_s10, 1 }
  0x26   : > { %s341_s13 = sshll.u32 %s334_s12, 4  ;;  %s1670_s19 = scalar_lea.sflag [#allocation6], %s330_s25  ;;  %s342_s13 = int_to_ptr.vmem [resolvable:$true] %s341_s13 }
  0x27   : > { %p1208_p2 = pneg %p1659_p0  ;;  %s1219_s15 = scalar_lea.vmem %s342_s13, 512 }
  0x28   : > { %p1220_p3 = scmp.ne.s32.totalorder %s342_s13, %s1219_s15  ;;  %s1520_s9 = smov [#allocation5]  }
  0x29   : > { %s1224_s29 = sshll.u32 %s1520_s9, 4  ;;  %s1225_s29 = int_to_ptr.vmem [resolvable:$false] %s1224_s29 }
  0x2a   : > { %s340_s16 = scalar_lea.hbm %s2060_s1, %s1655_s23  ;;  %p1222_p4 = pnand %p1220_p3, %p1208_p2 }
  0x2b   : > { %s1226_s20 = scalar_lea.vmem %s1225_s29, 1024  ;;  %p1227_p6 = scmp.lt.s32.totalorder %s342_s13, %s1225_s29 }
  0x2c   : > { %p1223_p5 = pneg %p1222_p4  ;;  %p1228_p7 = scmp.lt.s32.totalorder %s1226_s20, %s1219_s15 }
  0x2e   : > { %p1229_p10 = por %p1228_p7, %p1227_p6 }
  0x30   : > { %p1230_p13 = pnand %p1229_p10, %p1223_p5 }
  0x32   : > { %1233 = shalt.err (!%p1230_p13)
}
  0x33   : > { %s2039_s12 = smov 256   ;;  %s1522_s25 = smov 128  }
  0x34   : > { %s1523_s26 = smov 8   ;;  %p391_p3 = scmp.lt.s32.totalorder %s1518_s10, 3 }
  0x35   : > { %1129 = dma.hbm_to_vmem [thread:$0]  (!%p1659_p0), %s340_s16, 512, %s342_s13, %s1670_s19, %s2039_s12, %s1522_s25, %s1523_s26  }
  0x36   : > { %p1686_p4 = pnand %p1083_p1, %p391_p3  ;;  %s2062_s0 = sld [smem:[#allocation30_spill]] }
  0x37   : > { %s313_s15 = scalar_lea.vmem [#allocation2], %s1652_s22  ;;  %s310_s27 = scalar_lea.sflag [#allocation3], %s1649_s21 }
  0x38   : > { %s320_s1 = sshll.u32 %s313_s15, 4  ;;  %s1524_s13 = smov [#allocation2]   ;;  %s321_s1 = int_to_ptr.vmem [resolvable:$true] %s320_s1 }
  0x39   : > { %s1247_s8 = scalar_lea.vmem %s321_s1, 512  ;;  %s1252_s16 = sshll.u32 %s1524_s13, 4  ;;  %s1253_s16 = int_to_ptr.vmem [resolvable:$false] %s1252_s16 }
  0x3a   : > { %p1248_p5 = scmp.ne.s32.totalorder %s321_s1, %s1247_s8  ;;  %s1254_s12 = scalar_lea.vmem %s1253_s16, 1024 }
  0x3b   : > { %p1255_p1 = scmp.lt.s32.totalorder %s321_s1, %s1253_s16  ;;  %p1256_p10 = scmp.lt.s32.totalorder %s1254_s12, %s1247_s8 }
  0x3c   : > { %s319_s14 = scalar_lea.hbm %s2062_s0, %s1655_s23  ;;  %p1250_p6 = pnand %p1248_p5, %p1208_p2 }
  0x3d   : > { %p1257_p13 = por %p1256_p10, %p1255_p1 }
  0x3e   : > { %p1251_p7 = pneg %p1250_p6 }
  0x40   : > { %p1258_p3 = pnand %p1257_p13, %p1251_p7 }
  0x42   : > { %1261 = shalt.err (!%p1258_p3)
}
  0x43   : > { %s2063_s9 = smov 256   ;;  %s361_s13 = scalar_lea.hbm %s2025_s2, %s1655_s23 }
  0x44   : > { %1126 = dma.hbm_to_vmem [thread:$0]  (!%p1659_p0), %s319_s14, 512, %s321_s1, %s310_s27, %s2063_s9, %s1522_s25, %s1523_s26  }
  0x45   : > { %s355_s0 = scalar_lea.vmem [#allocation7], %s1652_s22  ;;  %s1525_s12 = smov [#allocation7]  }
  0x46   : > { %s362_s10 = sshll.u32 %s355_s0, 4  ;;  %s1280_s16 = sshll.u32 %s1525_s12, 4  ;;  %s363_s10 = int_to_ptr.vmem [resolvable:$true] %s362_s10  ;;  %s1281_s16 = int_to_ptr.vmem [resolvable:$false] %s1280_s16 }
  0x47   : > { %s1275_s8 = scalar_lea.vmem %s363_s10, 512  ;;  %s1282_s6 = scalar_lea.vmem %s1281_s16, 1024 }
  0x48   : > { %p1276_p5 = scmp.ne.s32.totalorder %s363_s10, %s1275_s8  ;;  %p1283_p1 = scmp.lt.s32.totalorder %s363_s10, %s1281_s16 }
  0x49   : > { %p1284_p10 = scmp.lt.s32.totalorder %s1282_s6, %s1275_s8 }
  0x4a   : > { %p1278_p6 = pnand %p1276_p5, %p1208_p2 }
  0x4b   : > { %p1285_p13 = por %p1284_p10, %p1283_p1 }
  0x4c   : > { %p1279_p7 = pneg %p1278_p6 }
  0x4e   : > { %p1286_p3 = pnand %p1285_p13, %p1279_p7 }
  0x50   : > { %1289 = shalt.err (!%p1286_p3)
}
  0x51   : > { %1132 = dma.hbm_to_vmem [thread:$0]  (!%p1659_p0), %s361_s13, 512, %s363_s10, %s1670_s19, %s2063_s9, %s1522_s25, %s1523_s26  }
  0x52   : > { %s382_s27 = scalar_lea.hbm %s2026_s3, %s1655_s23  ;;  %s376_s14 = scalar_lea.vmem [#allocation8], %s1652_s22 }
  0x53   : > { %s383_s6 = sshll.u32 %s376_s14, 4  ;;  %s373_s20 = scalar_lea.sflag [#allocation9], %s1649_s21  ;;  %s384_s6 = int_to_ptr.vmem [resolvable:$true] %s383_s6 }
  0x54   : > { %s1303_s15 = scalar_lea.vmem %s384_s6, 512  ;;  %s1526_s8 = smov [#allocation8]  }
  0x55   : > { %p1304_p5 = scmp.ne.s32.totalorder %s384_s6, %s1303_s15  ;;  %s1308_s12 = sshll.u32 %s1526_s8, 4  ;;  %s1309_s12 = int_to_ptr.vmem [resolvable:$false] %s1308_s12 }
  0x56   : > { %s1310_s16 = scalar_lea.vmem %s1309_s12, 1024  ;;  %p1311_p1 = scmp.lt.s32.totalorder %s384_s6, %s1309_s12 }
  0x57   : > { %p1306_p6 = pnand %p1304_p5, %p1208_p2  ;;  %p1312_p10 = scmp.lt.s32.totalorder %s1310_s16, %s1303_s15 }
  0x59   : > { %p1307_p7 = pneg %p1306_p6  ;;  %p1313_p13 = por %p1312_p10, %p1311_p1 }
  0x5b   : > { %p1314_p3 = pnand %p1313_p13, %p1307_p7 }
  0x5d   : > { %1317 = shalt.err (!%p1314_p3)
}
  0x5e   : > { %1135 = dma.hbm_to_vmem [thread:$0]  (!%p1659_p0), %s382_s27, 512, %s384_s6, %s373_s20, %s2063_s9, %s1522_s25, %s1523_s26  }
  0x5f   : > { %395 = sbr.rel (%p1686_p4) target bundleno = 235 (0xeb), region = 36  ;;  %s1735_s10 = sand.u32 (!%p1686_p4), 1, %s1502_s28  }
  0x60   : > { %s1084_s19 = sshll.u32 (!%p1686_p4), %s1735_s10, 5  ;;  %s398_s21 = scalar_lea.sflag (!%p1686_p4), [#allocation3], %s1735_s10 }
  0x61   : > { %s401_s22 = scalar_lea.vmem (!%p1686_p4), [#allocation2], %s1084_s19 }
  0x64   : > { %1473 = dma.done.wait (%p1629_p8), %s398_s21, 512  }
  0x65   : > { %1475 = vsyncadd (%p1629_p8), %s398_s21, 4294966784  ;;  %s1744_s23 = sand.u32 1, %s1609_s11   ;;  %s1747_s25 = scalar_lea.vmem [#allocation5], %s1084_s19 }
  0x66   : > { %s407_s24 = scalar_lea.sflag [#allocation6], %s1744_s23 }
  0x67   : > { %1477 = dma.done.wait (%p1629_p8), %s407_s24, 1024  }
  0x68   : > { %1479 = vsyncadd (%p1629_p8), %s407_s24, 4294966272  ;;  %s419_s26 = scalar_lea.vmem [#allocation7], %s1084_s19  ;;  %s425_s29 = scalar_lea.sflag [#allocation9], %s1735_s10 }
  0x69   : > { %s1754_s9 = scalar_lea.vmem [#allocation8], %s1084_s19 }
  0x6a   : > { %1481 = dma.done.wait (%p1629_p8), %s425_s29, 512  }
  0x6b   : > { %1483 = vsyncadd (%p1629_p8), %s425_s29, 4294966784  ;;  %s1088_s11 = sshll.u32 %s1735_s10, 2  ;;  %v1527_v0 = vmov 0.0   ;;  %v1776_v1 = vld [vmem:[%s401_s22] sm:$0xff]  ;;  %v1778_v2 = vld [vmem:[%s401_s22 + $0x8] sm:$0xff]  ;;  %vm562_vm0 = vcmask 1041409  }
  0x6c   : > { %s1761_s13 = scalar_lea.vmem [#allocation11], %s1088_s11  ;;  %s1764_s0 = scalar_lea.vmem [#allocation14], %s1088_s11  ;;  %v1780_v3 = vld [vmem:[%s401_s22 + $0x10] sm:$0xff]  ;;  %v1782_v4 = vld [vmem:[%s401_s22 + $0x18] sm:$0xff]  ;;  %v572_v5 = vmul.f32 %v1776_v1, %v1776_v1  ;;  %v573_v6 = vmul.f32 %v1778_v2, %v1778_v2  ;;  %v517_v8 = vld [vmem:[%s419_s26] sm:$0xff]  ;;  %v611_v15 = vrot.slane %v1776_v1, 4 }
  0x6d   : > { %505 = vst [vmem:[%s1761_s13] sm:$0xf] %v1527_v0  ;;  %507 = vst [vmem:[%s1764_s0] sm:$0xf] %v1527_v0  ;;  %s1767_s1 = scalar_lea.vmem [#allocation10], %s1088_s11  ;;  %s1770_s27 = scalar_lea.vmem [#allocation13], %s1088_s11  ;;  %v574_v7 = vmul.f32 %v1780_v3, %v1780_v3  ;;  %v518_v9 = vld [vmem:[%s419_s26 + $0x8] sm:$0xff]  ;;  %v575_v10 = vmul.f32 %v1782_v4, %v1782_v4  ;;  %v519_v11 = vld [vmem:[%s419_s26 + $0x10] sm:$0xff] }
  0x6e   : > { %504 = vst [vmem:[%s1767_s1] sm:$0xf] %v1527_v0  ;;  %506 = vst [vmem:[%s1770_s27] sm:$0xf] %v1527_v0  ;;  %s1773_s17 = scalar_lea.vmem [#allocation16], %s1088_s11  ;;  %v520_v12 = vld [vmem:[%s419_s26 + $0x18] sm:$0xff]  ;;  %v646_v13 = vrot.slane %v517_v8, 4  ;;  %v652_v14 = vrot.slane %v518_v9, 4 }
  0x6f   : > { %508 = vst [vmem:[%s1773_s17] sm:$0xf] %v1527_v0  ;;  %v576_v16 = vrot.slane %v572_v5, 4  ;;  %v582_v17 = vrot.slane %v573_v6, 4  ;;  %v588_v18 = vrot.slane %v574_v7, 4  ;;  %v658_v19 = vrot.slane %v519_v11, 4  ;;  %v513_v52 = vld [vmem:[%s1747_s25] sm:$0xff] }
  0x70   : > { %vm564_vm1 = vcmask 1042434   ;;  %v594_v20 = vrot.slane %v575_v10, 4  ;;  %v647_v21 = vadd.f32 %v646_v13, %v517_v8  ;;  %v653_v22 = vadd.f32 %v652_v14, %v518_v9  ;;  %v514_v57 = vld [vmem:[%s1747_s25 + $0x8] sm:$0xff]  ;;  %v515_v58 = vld [vmem:[%s1747_s25 + $0x10] sm:$0xff]  ;;  %v516_v63 = vld [vmem:[%s1747_s25 + $0x18] sm:$0xff]  ;;  %s1801_s14 = sshll.u32 %s1510_s30, 6 }
  0x71   : > { %v664_v23 = vrot.slane %v520_v12, 4  ;;  %vm566_vm2 = vcmask 1043459   ;;  %v577_v24 = vadd.f32 %v576_v16, %v572_v5  ;;  %v583_v25 = vadd.f32 %v582_v17, %v573_v6  ;;  %s788_s6 = sshll.u32 %s1764_s0, 4  ;;  %s762_s20 = sshll.u32 %s1761_s13, 4  ;;  %s1820_s6 = int_to_ptr.vmem [resolvable:$true] %s788_s6  ;;  %s1835_s20 = int_to_ptr.vmem [resolvable:$true] %s762_s20 }
  0x72   : > { %v589_v26 = vadd.f32 %v588_v18, %v574_v7  ;;  %v659_v27 = vadd.f32 %v658_v19, %v519_v11  ;;  %v595_v28 = vadd.f32 %v594_v20, %v575_v10  ;;  %v648_v29 = vrot.slane %v647_v21, 2  ;;  %s1818_s8 = scalar_lea.hbm %s2030_s7, %s1801_s14  ;;  %s1833_s19 = scalar_lea.hbm %s2028_s5, %s1801_s14 }
  0x73   : > { %v654_v30 = vrot.slane %v653_v22, 2  ;;  %v665_v31 = vadd.f32 %v664_v23, %v520_v12  ;;  %v578_v32 = vrot.slane %v577_v24, 2  ;;  %v584_v33 = vrot.slane %v583_v25, 2  ;;  %s731_s21 = scalar_lea.sflag [#allocation15], %s1744_s23  ;;  %s1318_s22 = scalar_lea.vmem %s1820_s6, 64 }
  0x74   : > { %v590_v34 = vrot.slane %v589_v26, 2  ;;  %v660_v35 = vrot.slane %v659_v27, 2  ;;  %v596_v36 = vrot.slane %v595_v28, 2  ;;  %v649_v37 = vadd.f32 %v648_v29, %v647_v21  ;;  %v645_v5 = vld [vmem:[%s1764_s0] sm:$0xf]  ;;  %p1319_p8 = scmp.ne.s32.totalorder %s1820_s6, %s1318_s22  ;;  %s1528_s24 = smov [#allocation14]  }
  0x75   : > { %v655_v38 = vadd.f32 %v654_v30, %v653_v22  ;;  %v666_v39 = vrot.slane %v665_v31, 2  ;;  %v579_v40 = vadd.f32 %v578_v32, %v577_v24  ;;  %v585_v41 = vadd.f32 %v584_v33, %v583_v25  ;;  %v571_v9 = vld [vmem:[%s1761_s13] sm:$0xf]  ;;  %s1322_s25 = sshll.u32 %s1528_s24, 4  ;;  %s1323_s25 = int_to_ptr.vmem [resolvable:$false] %s1322_s25 }
  0x76   : > { %v591_v42 = vadd.f32 %v590_v34, %v589_v26  ;;  %v661_v43 = vadd.f32 %v660_v35, %v659_v27  ;;  %v597_v44 = vadd.f32 %v596_v36, %v595_v28  ;;  %v650_v45 = vrot.slane %v649_v37, 1  ;;  %p1320_p0 = pnand %p1319_p8, %p1633_p9  ;;  %s1324_s26 = scalar_lea.vmem %s1323_s25, 128 }
  0x77   : > { %v656_v46 = vrot.slane %v655_v38, 1  ;;  %v667_v47 = vadd.f32 %v666_v39, %v665_v31  ;;  %v580_v48 = vrot.slane %v579_v40, 1  ;;  %v586_v49 = vrot.slane %v585_v41, 1  ;;  %p1325_p4 = scmp.lt.s32.totalorder %s1820_s6, %s1323_s25  ;;  %p1326_p5 = scmp.lt.s32.totalorder %s1324_s26, %s1318_s22 }
  0x78   : > { %v592_v50 = vrot.slane %v591_v42, 1  ;;  %v662_v51 = vrot.slane %v661_v43, 1  ;;  %v598_v53 = vrot.slane %v597_v44, 1  ;;  %v651_v54 = vadd.f32 %v650_v45, %v649_v37  ;;  %p1321_p2 = pneg %p1320_p0 }
  0x79   : > { %v657_v55 = vadd.f32 %v656_v46, %v655_v38  ;;  %v668_v56 = vrot.slane %v667_v47, 1  ;;  %v581_v59 = vadd.f32 %v580_v48, %v579_v40  ;;  %v587_v60 = vadd.f32 %v586_v49, %v585_v41  ;;  %p1327_p6 = por %p1326_p5, %p1325_p4 }
  0x7a   : > { %v593_v61 = vadd.f32 %v592_v50, %v591_v42  ;;  %v663_v62 = vadd.f32 %v662_v51, %v661_v43  ;;  %v599_v0 = vadd.f32 %v598_v53, %v597_v44  ;;  %v525_v8 = vsub.f32 %v1776_v1, %v513_v52 }
  0x7b   : > { %v669_v6 = vadd.f32 %v668_v56, %v667_v47  ;;  %v674_v7 = vsel %vm562_vm0, %v657_v55, %v651_v54  ;;  %v604_v10 = vsel %vm562_vm0, %v587_v60, %v581_v59  ;;  %v526_v12 = vsub.f32 %v1778_v2, %v514_v57  ;;  %p1328_p7 = pnand %p1327_p6, %p1321_p2 }
  0x7c   : > { %v675_v11 = vsel %vm564_vm1, %v663_v62, %v674_v7  ;;  %v527_v13 = vsub.f32 %v1780_v3, %v515_v58  ;;  %v605_v14 = vsel %vm564_vm1, %v593_v61, %v604_v10  ;;  %v528_v17 = vsub.f32 %v1782_v4, %v516_v63 }
  0x7d   : > { %v676_v16 = vsel %vm566_vm2, %v669_v6, %v675_v11  ;;  %v530_v18 = vmul.f32 %v525_v8, %v525_v8  ;;  %v606_v19 = vsel %vm566_vm2, %v599_v0, %v605_v14  ;;  %v531_v21 = vmul.f32 %v526_v12, %v526_v12 }
  0x7e   : > { %v678_v20 = vadd.f32 %v676_v16, %v645_v5  ;;  %v532_v22 = vmul.f32 %v527_v13, %v527_v13  ;;  %v608_v23 = vadd.f32 %v606_v19, %v571_v9  ;;  %v1822_v24 = vmul.f32 %v528_v17, %v528_v17 }
  0x7f   : > { %v534_v25 = vrot.slane %v530_v18, 4  ;;  %v1827_v26 = vadd.f32 %v611_v15, %v1776_v1  ;;  %v540_v27 = vrot.slane %v531_v21, 4  ;;  %v617_v29 = vrot.slane %v1778_v2, 4 }
  0x80   : > { %679 = vst [vmem:[%s1764_s0] sm:$0xf] %v678_v20  ;;  %v546_v28 = vrot.slane %v532_v22, 4  ;;  %v623_v30 = vrot.slane %v1780_v3, 4  ;;  %609 = vst [vmem:[%s1761_s13] sm:$0xf] %v608_v23  ;;  %v552_v1 = vrot.slane %v1822_v24, 4  ;;  %v629_v32 = vrot.slane %v1782_v4, 4 }
  0x81   : > { %v1841_v31 = vadd.f32 %v534_v25, %v530_v18  ;;  %v613_v15 = vrot.slane %v1827_v26, 2 }
  0x82   : > { %1331 = shalt.err (!%p1328_p7)
}
  0x83   : > { %s1332_s29 = scalar_lea.hbm %s1818_s8, 64  ;;  %s1336_s0 = scalar_lea.hbm %s2030_s7, 128 }
  0x84   : > { %p1333_p1 = scmp.ne.s32.totalorder %s1818_s8, %s1332_s29  ;;  %p1337_p3 = scmp.lt.s32.totalorder %s1818_s8, %s2030_s7 }
  0x85   : > { %p1338_p8 = scmp.lt.s32.totalorder %s1336_s0, %s1332_s29 }
  0x86   : > { %p1334_p10 = pnand %p1333_p1, %p1633_p9 }
  0x87   : > { %p1339_p0 = por %p1338_p8, %p1337_p3 }
  0x88   : > { %p1335_p13 = pneg %p1334_p10 }
  0x8a   : > { %p1340_p2 = pnand %p1339_p0, %p1335_p13 }
  0x8c   : > { %1343 = shalt.err (!%p1340_p2)
}
  0x8d   : > { %1116 = dma.vmem_to_hbm [thread:$0]  (%p1633_p9), %s1820_s6, 64, %s1818_s8, %s731_s21   ;;  %v541_v33 = vadd.f32 %v540_v27, %v531_v21  ;;  %v547_v34 = vadd.f32 %v546_v28, %v532_v22  ;;  %v618_v35 = vadd.f32 %v617_v29, %v1778_v2  ;;  %v624_v36 = vadd.f32 %v623_v30, %v1780_v3 }
  0x8e   : > { %s721_s12 = scalar_lea.sflag [#allocation12], %s1744_s23  ;;  %s1344_s16 = scalar_lea.vmem %s1835_s20, 64 }
  0x8f   : > { %p1345_p4 = scmp.ne.s32.totalorder %s1835_s20, %s1344_s16  ;;  %s1529_s22 = smov [#allocation11]  }
  0x90   : > { %s1348_s24 = sshll.u32 %s1529_s22, 4  ;;  %s1349_s24 = int_to_ptr.vmem [resolvable:$false] %s1348_s24 }
  0x91   : > { %p1346_p5 = pnand %p1345_p4, %p1633_p9  ;;  %s1350_s25 = scalar_lea.vmem %s1349_s24, 128 }
  0x92   : > { %p1351_p7 = scmp.lt.s32.totalorder %s1835_s20, %s1349_s24  ;;  %p1352_p1 = scmp.lt.s32.totalorder %s1350_s25, %s1344_s16 }
  0x93   : > { %p1347_p6 = pneg %p1346_p5 }
  0x94   : > { %p1353_p10 = por %p1352_p1, %p1351_p7 }
  0x96   : > { %p1354_p13 = pnand %p1353_p10, %p1347_p6 }
  0x98   : > { %1357 = shalt.err (!%p1354_p13)
}
  0x99   : > { %s1358_s6 = scalar_lea.hbm %s1833_s19, 64  ;;  %s1362_s29 = scalar_lea.hbm %s2028_s5, 128 }
  0x9a   : > { %p1359_p3 = scmp.ne.s32.totalorder %s1833_s19, %s1358_s6  ;;  %p1363_p2 = scmp.lt.s32.totalorder %s1833_s19, %s2028_s5 }
  0x9b   : > { %p1364_p4 = scmp.lt.s32.totalorder %s1362_s29, %s1358_s6 }
  0x9c   : > { %p1360_p8 = pnand %p1359_p3, %p1633_p9 }
  0x9d   : > { %p1365_p5 = por %p1364_p4, %p1363_p2 }
  0x9e   : > { %p1361_p0 = pneg %p1360_p8 }
  0xa0   : > { %p1366_p6 = pnand %p1365_p5, %p1361_p0 }
  0xa2   : > { %1369 = shalt.err (!%p1366_p6)
}
  0xa3   : > { %1114 = dma.vmem_to_hbm [thread:$0]  (%p1633_p9), %s1835_s20, 64, %s1833_s19, %s721_s12   ;;  %v536_v2 = vrot.slane %v1841_v31, 2  ;;  %v553_v3 = vadd.f32 %v552_v1, %v1822_v24  ;;  %v614_v37 = vadd.f32 %v613_v15, %v1827_v26  ;;  %v630_v38 = vadd.f32 %v629_v32, %v1782_v4  ;;  %v521_v51 = vld [vmem:[%s1754_s9] sm:$0xff]  ;;  %v522_v59 = vld [vmem:[%s1754_s9 + $0x8] sm:$0xff]  ;;  %v523_v63 = vld [vmem:[%s1754_s9 + $0x10] sm:$0xff] }
  0xa4   : > { %v542_v39 = vrot.slane %v541_v33, 2  ;;  %v548_v40 = vrot.slane %v547_v34, 2  ;;  %v619_v41 = vrot.slane %v618_v35, 2  ;;  %v625_v42 = vrot.slane %v624_v36, 2  ;;  %v524_v0 = vld [vmem:[%s1754_s9 + $0x18] sm:$0xff]  ;;  %s749_s9 = sshll.u32 %s1767_s1, 4  ;;  %s1917_s30 = scalar_lea.hbm %s2027_s4, %s1801_s14  ;;  %s1919_s9 = int_to_ptr.vmem [resolvable:$true] %s749_s9 }
  0xa5   : > { %v537_v43 = vadd.f32 %v536_v2, %v1841_v31  ;;  %v554_v44 = vrot.slane %v553_v3, 2  ;;  %v615_v45 = vrot.slane %v614_v37, 1  ;;  %v631_v46 = vrot.slane %v630_v38, 2  ;;  %v529_v10 = vld [vmem:[%s1767_s1] sm:$0xf]  ;;  %s775_s20 = sshll.u32 %s1770_s27, 4  ;;  %s1921_s20 = int_to_ptr.vmem [resolvable:$true] %s775_s20 }
  0xa6   : > { %v543_v47 = vadd.f32 %v542_v39, %v541_v33  ;;  %v549_v48 = vadd.f32 %v548_v40, %v547_v34  ;;  %v620_v49 = vadd.f32 %v619_v41, %v618_v35  ;;  %v626_v50 = vadd.f32 %v625_v42, %v624_v36  ;;  %v610_v17 = vld [vmem:[%s1770_s27] sm:$0xf]  ;;  %s2064_s22 = sld [smem:[#allocation32_spill]]  ;;  %s716_s25 = scalar_lea.sflag [#allocation4], %s1735_s10 }
  0xa7   : > { %v538_v52 = vrot.slane %v537_v43, 1  ;;  %v555_v53 = vadd.f32 %v554_v44, %v553_v3  ;;  %v616_v4 = vadd.f32 %v615_v45, %v614_v37  ;;  %v632_v54 = vadd.f32 %v631_v46, %v630_v38  ;;  %s1370_s6 = scalar_lea.vmem %s1919_s9, 64  ;;  %s1530_s8 = smov [#allocation10]  }
  0xa8   : > { %v544_v55 = vrot.slane %v543_v47, 1  ;;  %v550_v56 = vrot.slane %v549_v48, 1  ;;  %v621_v57 = vrot.slane %v620_v49, 1  ;;  %v627_v58 = vrot.slane %v626_v50, 1  ;;  %p1371_p7 = scmp.ne.s32.totalorder %s1919_s9, %s1370_s6  ;;  %s1374_s26 = sshll.u32 %s1530_s8, 4  ;;  %s1375_s26 = int_to_ptr.vmem [resolvable:$false] %s1374_s26 }
  0xa9   : > { %v539_v60 = vadd.f32 %v538_v52, %v537_v43  ;;  %v556_v61 = vrot.slane %v555_v53, 1  ;;  %v633_v62 = vrot.slane %v632_v54, 1  ;;  %v681_v5 = vrot.slane %v521_v51, 4  ;;  %s1376_s29 = scalar_lea.vmem %s1375_s26, 128  ;;  %p1377_p13 = scmp.lt.s32.totalorder %s1919_s9, %s1375_s26 }
  0xaa   : > { %v545_v6 = vadd.f32 %v544_v55, %v543_v47  ;;  %v551_v7 = vadd.f32 %v550_v56, %v549_v48  ;;  %v622_v8 = vadd.f32 %v621_v57, %v620_v49  ;;  %v628_v9 = vadd.f32 %v627_v58, %v626_v50  ;;  %p1372_p1 = pnand %p1371_p7, %p1633_p9  ;;  %p1378_p3 = scmp.lt.s32.totalorder %s1376_s29, %s1370_s6 }
  0xab   : > { %v557_v11 = vadd.f32 %v556_v61, %v555_v53  ;;  %v634_v12 = vadd.f32 %v633_v62, %v632_v54  ;;  %v682_v13 = vadd.f32 %v681_v5, %v521_v51  ;;  %v687_v14 = vrot.slane %v522_v59, 4 }
  0xac   : > { %v563_v16 = vsel %vm562_vm0, %v545_v6, %v539_v60  ;;  %v639_v18 = vsel %vm562_vm0, %v622_v8, %v616_v4  ;;  %v693_v19 = vrot.slane %v523_v63, 4  ;;  %v699_v20 = vrot.slane %v524_v0, 4  ;;  %s1927_s24 = scalar_lea.hbm %s2064_s22, %s1801_s14  ;;  %p1373_p10 = pneg %p1372_p1 }
  0xad   : > { %v565_v21 = vsel %vm564_vm1, %v551_v7, %v563_v16  ;;  %v640_v22 = vsel %vm564_vm1, %v628_v9, %v639_v18  ;;  %v683_v23 = vrot.slane %v682_v13, 2  ;;  %v688_v24 = vadd.f32 %v687_v14, %v522_v59  ;;  %p1379_p8 = por %p1378_p3, %p1377_p13 }
  0xae   : > { %v567_v25 = vsel %vm566_vm2, %v557_v11, %v565_v21  ;;  %v641_v26 = vsel %vm566_vm2, %v634_v12, %v640_v22  ;;  %v694_v27 = vadd.f32 %v693_v19, %v523_v63  ;;  %v700_v28 = vadd.f32 %v699_v20, %v524_v0 }
  0xaf   : > { %v569_v29 = vadd.f32 %v567_v25, %v529_v10  ;;  %v643_v30 = vadd.f32 %v641_v26, %v610_v17  ;;  %v684_v31 = vadd.f32 %v683_v23, %v682_v13  ;;  %v689_v1 = vrot.slane %v688_v24, 2  ;;  %p1380_p0 = pnand %p1379_p8, %p1373_p10 }
  0xb0   : > { %v695_v15 = vrot.slane %v694_v27, 2  ;;  %v701_v32 = vrot.slane %v700_v28, 2 }
  0xb1   : > { %570 = vst [vmem:[%s1767_s1] sm:$0xf] %v569_v29  ;;  %644 = vst [vmem:[%s1770_s27] sm:$0xf] %v643_v30  ;;  %v685_v33 = vrot.slane %v684_v31, 1  ;;  %v690_v34 = vadd.f32 %v689_v1, %v688_v24 }
  0xb2   : > { %v696_v35 = vadd.f32 %v695_v15, %v694_v27  ;;  %v702_v36 = vadd.f32 %v701_v32, %v700_v28 }
  0xb3   : > { %1383 = shalt.err (!%p1380_p0)
}
  0xb4   : > { %s1384_s1 = scalar_lea.hbm %s1917_s30, 64  ;;  %s1388_s11 = scalar_lea.hbm %s2027_s4, 128 }
  0xb5   : > { %p1385_p2 = scmp.ne.s32.totalorder %s1917_s30, %s1384_s1  ;;  %p1389_p6 = scmp.lt.s32.totalorder %s1917_s30, %s2027_s4 }
  0xb6   : > { %p1390_p7 = scmp.lt.s32.totalorder %s1388_s11, %s1384_s1 }
  0xb7   : > { %p1386_p4 = pnand %p1385_p2, %p1633_p9 }
  0xb8   : > { %p1391_p1 = por %p1390_p7, %p1389_p6 }
  0xb9   : > { %p1387_p5 = pneg %p1386_p4 }
  0xbb   : > { %p1392_p10 = pnand %p1391_p1, %p1387_p5 }
  0xbd   : > { %1395 = shalt.err (!%p1392_p10)
}
  0xbe   : > { %1113 = dma.vmem_to_hbm [thread:$0]  (%p1633_p9), %s1919_s9, 64, %s1917_s30, %s716_s25   ;;  %v686_v2 = vadd.f32 %v685_v33, %v684_v31  ;;  %v691_v3 = vrot.slane %v690_v34, 1 }
  0xbf   : > { %s1396_s0 = scalar_lea.vmem %s1921_s20, 64  ;;  %s1531_s15 = smov [#allocation13]  }
  0xc0   : > { %p1397_p13 = scmp.ne.s32.totalorder %s1921_s20, %s1396_s0  ;;  %s1400_s16 = sshll.u32 %s1531_s15, 4  ;;  %s1401_s16 = int_to_ptr.vmem [resolvable:$false] %s1400_s16 }
  0xc1   : > { %s1402_s6 = scalar_lea.vmem %s1401_s16, 128  ;;  %p1403_p0 = scmp.lt.s32.totalorder %s1921_s20, %s1401_s16 }
  0xc2   : > { %p1398_p3 = pnand %p1397_p13, %p1633_p9  ;;  %p1404_p2 = scmp.lt.s32.totalorder %s1402_s6, %s1396_s0 }
  0xc4   : > { %p1399_p8 = pneg %p1398_p3  ;;  %p1405_p4 = por %p1404_p2, %p1403_p0 }
  0xc6   : > { %p1406_p5 = pnand %p1405_p4, %p1399_p8 }
  0xc8   : > { %1409 = shalt.err (!%p1406_p5)
}
  0xc9   : > { %s1410_s9 = scalar_lea.hbm %s1927_s24, 64  ;;  %s1414_s8 = scalar_lea.hbm %s2064_s22, 128 }
  0xca   : > { %p1411_p6 = scmp.ne.s32.totalorder %s1927_s24, %s1410_s9  ;;  %p1415_p10 = scmp.lt.s32.totalorder %s1927_s24, %s2064_s22 }
  0xcb   : > { %p1416_p13 = scmp.lt.s32.totalorder %s1414_s8, %s1410_s9 }
  0xcc   : > { %p1412_p7 = pnand %p1411_p6, %p1633_p9 }
  0xcd   : > { %p1417_p3 = por %p1416_p13, %p1415_p10 }
  0xce   : > { %p1413_p1 = pneg %p1412_p7 }
  0xd0   : > { %p1418_p8 = pnand %p1417_p3, %p1413_p1 }
  0xd2   : > { %1421 = shalt.err (!%p1418_p8)
}
  0xd3   : > { %1115 = dma.vmem_to_hbm [thread:$0]  (%p1633_p9), %s1921_s20, 64, %s1927_s24, %s721_s12   ;;  %v697_v37 = vrot.slane %v696_v35, 1  ;;  %v703_v38 = vrot.slane %v702_v36, 1  ;;  %v692_v39 = vadd.f32 %v691_v3, %v690_v34  ;;  %v680_v42 = vld [vmem:[%s1773_s17] sm:$0xf] }
  0xd4   : > { %s801_s1 = sshll.u32 %s1773_s17, 4  ;;  %s2065_s11 = sld [smem:[#allocation33_spill]]  ;;  %s802_s1 = int_to_ptr.vmem [resolvable:$true] %s801_s1 }
  0xd5   : > { %v698_v40 = vadd.f32 %v697_v37, %v696_v35  ;;  %v704_v41 = vadd.f32 %v703_v38, %v702_v36  ;;  %v709_v43 = vsel %vm562_vm0, %v692_v39, %v686_v2  ;;  %s1422_s20 = scalar_lea.vmem %s802_s1, 64  ;;  %s1532_s24 = smov [#allocation16]  }
  0xd6   : > { %p1423_p0 = scmp.ne.s32.totalorder %s802_s1, %s1422_s20  ;;  %s1426_s13 = sshll.u32 %s1532_s24, 4  ;;  %s1427_s13 = int_to_ptr.vmem [resolvable:$false] %s1426_s13 }
  0xd7   : > { %v710_v44 = vsel %vm564_vm1, %v698_v40, %v709_v43  ;;  %s1428_s19 = scalar_lea.vmem %s1427_s13, 128  ;;  %p1429_p5 = scmp.lt.s32.totalorder %s802_s1, %s1427_s13 }
  0xd8   : > { %v711_v45 = vsel %vm566_vm2, %v704_v41, %v710_v44  ;;  %p1424_p2 = pnand %p1423_p0, %p1633_p9  ;;  %p1430_p6 = scmp.lt.s32.totalorder %s1428_s19, %s1422_s20 }
  0xd9   : > { %v713_v46 = vadd.f32 %v711_v45, %v680_v42 }
  0xda   : > { %s799_s12 = scalar_lea.hbm %s2065_s11, %s1801_s14  ;;  %p1425_p4 = pneg %p1424_p2 }
  0xdb   : > { %714 = vst [vmem:[%s1773_s17] sm:$0xf] %v713_v46  ;;  %p1431_p7 = por %p1430_p6, %p1429_p5 }
  0xdd   : > { %p1432_p1 = pnand %p1431_p7, %p1425_p4 }
  0xdf   : > { %1435 = shalt.err (!%p1432_p1)
}
  0xe0   : > { %s1436_s0 = scalar_lea.hbm %s799_s12, 64  ;;  %s1440_s15 = scalar_lea.hbm %s2065_s11, 128 }
  0xe1   : > { %p1437_p10 = scmp.ne.s32.totalorder %s799_s12, %s1436_s0  ;;  %p1441_p8 = scmp.lt.s32.totalorder %s799_s12, %s2065_s11 }
  0xe2   : > { %p1442_p0 = scmp.lt.s32.totalorder %s1440_s15, %s1436_s0 }
  0xe3   : > { %p1438_p13 = pnand %p1437_p10, %p1633_p9 }
  0xe4   : > { %p1443_p2 = por %p1442_p0, %p1441_p8 }
  0xe5   : > { %p1439_p3 = pneg %p1438_p13 }
  0xe7   : > { %p1444_p12 = pnand %p1443_p2, %p1439_p3 }
  0xe9   : > { %1447 = shalt.err (!%p1444_p12)
}
  0xea   : > { %1117 = dma.vmem_to_hbm [thread:$0]  (%p1633_p9), %s802_s1, 64, %s799_s12, %s731_s21  }
  0xeb PF: > { %s2066_s9 = sld [smem:[#allocation23_spill]] }
  0xec   : > { %s2068_s25 = sld [smem:[#allocation26_spill]] }
  0xf1   : > { %s813_s8 = sand.u32 1, %s2066_s9  }
  0xf2   : > { %p2069_p4 = scmp.ge.s32.totalorder %s2068_s25, 2  ;;  %s814_s26 = scalar_lea.sflag [#allocation4], %s813_s8 }
  0xf4   : > { %p1137_p5 = pnand %p2069_p4, %p1642_p11 }
  0xf6   : > { %p1138_p6 = pneg %p1137_p5 }
  0xf8   : > { %1485 = dma.done.wait (%p1138_p6), %s814_s26, 64  }
  0xf9   : > { %1487 = vsyncadd (%p1138_p6), %s814_s26, 4294967232  ;;  %s2070_s29 = sadd.s32 4294967294, %s2068_s25  }
  0xfa   : > { %s822_s10 = sand.u32 1, %s2070_s29  }
  0xfb   : > { %s823_s27 = scalar_lea.sflag [#allocation12], %s822_s10 }
  0xfc   : > { %1489 = dma.done.wait (%p1138_p6), %s823_s27, 128  }
  0xfd   : > { %1491 = vsyncadd (%p1138_p6), %s823_s27, 4294967168  ;;  %s841_s18 = scalar_lea.sflag [#allocation15], %s822_s10 }
  0xfe   : > { %1493 = dma.done.wait (%p1138_p6), %s841_s18, 128  }
  0xff   : > { %1495 = vsyncadd (%p1138_p6), %s841_s18, 4294967168  ;;  %s37_s10 = sadd.s32 1, %s2068_s25   ;;  %s2071_s23 = sld [smem:[#allocation24_spill]] }
 0x100   : > { %p34_p9 = scmp.ge.s32.totalorder %s37_s10, 4   ;;  %s2072_s29 = sld [smem:[#allocation28_spill]] }
 0x101   : > { %s2073_s30 = sld [smem:[#allocation25_spill]]  ;;  %s2075_s27 = smov %s1502_s28 }
 0x102   : > { %s2074_s9 = sld [smem:[#allocation27_spill]]  ;;  %36 = sbr.rel (!%p34_p9) target bundleno = 19 (0x13), region = 186 }
 0x105   : > { %s2076_s28 = smov %s2071_s23 }
 0x107   :  { %855 = vsyncpa [#allocation3], 1 }
 0x108   :  { %857 = vsyncpa [#allocation3 + $0x1], 1 }
 0x109   :  { %858 = vsyncpa [#allocation6], 1 }
 0x10a   :  { %860 = vsyncpa [#allocation6 + $0x1], 1 }
 0x10b   :  { %861 = vsyncpa [#allocation9], 1 }
 0x10c   :  { %863 = vsyncpa [#allocation9 + $0x1], 1 }
 0x10d   :  { %864 = vsyncpa [#allocation4], 1 }
 0x10e   :  { %866 = vsyncpa [#allocation4 + $0x1], 1 }
 0x10f   :  { %867 = vsyncpa [#allocation12], 1 }
 0x110   :  { %869 = vsyncpa [#allocation12 + $0x1], 1 }
 0x111   :  { %870 = vsyncpa [#allocation15], 1 }
 0x112   :  { %872 = vsyncpa [#allocation15 + $0x1], 1 }

</bundles_post_ra>
